<compile_context>
chip_gen: v5e
topology: v5e:2x2
jax: 0.10.0
libtpu: 0.0.40
codegen_flags: <defaults>
</compile_context>

<pallas_src>
import jax
import jax.numpy as jnp
from jax.experimental import pallas as pl
from jax.experimental.pallas import tpu as pltpu


def generator_kernel(x_ref, w_ref, b_ref, o_ref, m_ref, l_ref, mrec_ref):
    # x_ref:   (tm, D)      compute dtype -- row tile (resident across vocab axis)
    # w_ref:   (D, tn)      compute dtype -- streamed vocab slice of W^T
    # b_ref:   (1, tn)      float32       -- vocab slice of bias
    # o_ref:   (tm, V)      out dtype     -- resident across the vocab axis
    # m_ref:   (tm, 1)      float32       -- running max        (scratch)
    # l_ref:   (tm, 1)      float32       -- running denominator (scratch)
    # mrec_ref:(nv, tm, 1)  float32       -- max used per vocab tile (scratch)
    j = pl.program_id(1)
    nv = mrec_ref.shape[0]          # static number of vocab tiles
    tn = w_ref.shape[1]

    # Scratch persists across grid steps -> re-init at j == 0 of EVERY row tile.
    @pl.when(j == 0)
    def _init():
        m_ref[...] = jnp.full_like(m_ref, -jnp.inf)
        l_ref[...] = jnp.zeros_like(l_ref)

    # MXU matmul for this vocab slice, f32 accumulation, bias folded in once.
    logits = jnp.dot(x_ref[...], w_ref[...], preferred_element_type=jnp.float32)
    logits = logits + b_ref[...]

    # Online softmax update: exp / max / sum overlap the MXU in the same body.
    m_prev = m_ref[...]
    m_new = jnp.maximum(m_prev, logits.max(axis=-1, keepdims=True))
    e = jnp.exp(logits - m_new)
    l_ref[...] = l_ref[...] * jnp.exp(m_prev - m_new) + jnp.sum(e, axis=-1, keepdims=True)
    m_ref[...] = m_new
    mrec_ref[j] = m_new             # remember the max this tile was scaled with

    # Stash un-normalized exponentials straight into the resident output block.
    col = pl.multiple_of(j * tn, tn)
    o_ref[:, pl.ds(col, tn)] = e.astype(o_ref.dtype)

    # Single rescale pass over the (tm, V) block once all vocab tiles are done.
    @pl.when(j == pl.num_programs(1) - 1)
    def _finalize():
        inv_l = pl.reciprocal(l_ref[...], approx=False)   # exact normalization
        m_final = m_ref[...]
        for jj in range(nv):                              # static unroll
            scale = jnp.exp(mrec_ref[jj] - m_final) * inv_l
            sl = slice(jj * tn, (jj + 1) * tn)
            tile = o_ref[:, sl].astype(jnp.float32)
            o_ref[:, sl] = (tile * scale).astype(o_ref.dtype)


def _vmem_capacity_bytes(default=64 << 20):
    """Physical VMEM of the current generation; conservative fallback (v7x)."""
    try:
        info = pltpu.get_tpu_info()
        cap = getattr(info, "vmem_capacity_bytes", None)
        if cap:
            return int(cap)
    except Exception:
        pass
    return default


def generator_forward(x, w, b, *, tm=None, tn=None, compute_dtype=jnp.bfloat16,
                      out_dtype=None, vmem_limit_bytes=None):
    """softmax(x @ w + b, axis=-1).

    x: (B, S, D) ; w: (D, V) (torch nn.Linear weight transposed) ; b: (V,)
    compute_dtype: MXU operand dtype (bf16 default; accumulation / softmax
                   statistics always stay f32).
    out_dtype:     dtype of the emitted probabilities (defaults to x.dtype).
    """
    B, S, D = x.shape
    Dw, V = w.shape
    assert Dw == D, "weight must be stored transposed as (d_embedding, vocab)"
    rows = B * S

    out_dtype = out_dtype or x.dtype
    cbytes = jnp.dtype(compute_dtype).itemsize
    obytes = jnp.dtype(out_dtype).itemsize

    cap = _vmem_capacity_bytes()
    budget = cap - (8 << 20)                 # leave headroom for compiler scratch

    # --- vocab tile: keep the double-buffered (D, tn) weight slice small ----
    if tn is None:
        tn = min(1024, V)
        while tn > 256 and 2 * D * tn * cbytes > (8 << 20):
            tn //= 2
        if V % tn != 0:
            cand = V
            for c in (2048, 1024, 512, 256, 128):
                if c <= tn and V % c == 0:
                    cand = c
                    break
            tn = cand
    tn = int(min(tn, V))
    assert V % tn == 0, f"vocab={V} must be divisible by tn={tn}"
    assert tn == V or tn % 128 == 0, "vocab tile must be lane-dense (mult of 128)"
    nv = V // tn

    # --- row tile: size against the real per-generation VMEM budget ---------
    auto_tm = tm is None
    if auto_tm:
        tm = 256
    tm = int(min(tm, rows))
    assert rows % tm == 0, f"rows={rows} must be divisible by tm={tm}"

    def est_bytes(tm_):
        return (2 * tm_ * V * obytes          # double-buffered (tm, V) output block
                + 2 * tm_ * D * cbytes        # x row tile
                + 2 * D * tn * cbytes         # streamed weight slice
                + 2 * tn * 4                  # bias slice
                + (nv + 4) * tm_ * 4)         # online-softmax stats scratch

    if auto_tm:
        # plenty of VMEM (v5e/v6e): grow tm -> halves weight-stream HBM traffic
        while tm * 2 <= 512 and rows % (tm * 2) == 0 and est_bytes(tm * 2) <= budget:
            tm *= 2
    # tight VMEM (v7x 64 MiB): shrink tm until the working set fits
    while tm > 8 and tm % 2 == 0 and est_bytes(tm) > budget:
        tm //= 2
    assert rows % tm == 0, f"rows={rows} must be divisible by tm={tm}"

    # Always set an explicit scoped-VMEM limit, clamped to physical capacity
    # (v5e's 16 MiB scoped default is otherwise too small; v7x must not exceed 64 MiB).
    if vmem_limit_bytes is None:
        est = est_bytes(tm)
        vmem_limit_bytes = int(min(cap - (1 << 20),
                                   max(int(est * 1.3) + (4 << 20), 16 << 20)))

    x2 = x.reshape(rows, D).astype(compute_dtype)
    w2 = w.astype(compute_dtype)
    b2 = b.reshape(1, V).astype(jnp.float32)

    out = pl.pallas_call(
        generator_kernel,
        out_shape=jax.ShapeDtypeStruct((rows, V), out_dtype),
        grid_spec=pltpu.PrefetchScalarGridSpec(
            num_scalar_prefetch=0,
            grid=(rows // tm, nv),                             # vocab axis innermost
            in_specs=[
                pl.BlockSpec((tm, D), lambda i, j: (i, 0)),    # row tile of x (resident over j)
                pl.BlockSpec((D, tn), lambda i, j: (0, j)),    # streamed weight slice
                pl.BlockSpec((1, tn), lambda i, j: (0, j)),    # bias slice
            ],
            out_specs=pl.BlockSpec((tm, V), lambda i, j: (i, 0)),  # resident over j
            scratch_shapes=[
                pltpu.VMEM((tm, 1), jnp.float32),              # running max
                pltpu.VMEM((tm, 1), jnp.float32),              # running denominator
                pltpu.VMEM((nv, tm, 1), jnp.float32),          # per-tile max record
            ],
        ),
        compiler_params=pltpu.CompilerParams(
            dimension_semantics=("parallel", "arbitrary"),
            vmem_limit_bytes=vmem_limit_bytes,
        ),
    )(x2, w2, b2)
    return out.reshape(B, S, V)


if __name__ == "__main__":
    # deterministic params & inputs (small, but lane-dense D and tiled vocab)
    d_embedding = 128
    vocab = 512
    batch, seq = 2, 8

    key = jax.random.PRNGKey(0)
    kx, kw, kb = jax.random.split(key, 3)

    x = jax.random.normal(kx, (batch, seq, d_embedding), dtype=jnp.float32)
    # nn.Linear(d_embedding, vocab): weight (vocab, d_embedding), bias (vocab,)
    # stored transposed as (d_embedding, vocab) for the kernel's matmul
    w_t = jax.random.normal(kw, (d_embedding, vocab), dtype=jnp.float32) * 0.1
    b = jax.random.normal(kb, (vocab,), dtype=jnp.float32) * 0.1

    ref = jax.nn.softmax(jnp.einsum("bsd,dv->bsv", x, w_t) + b, axis=-1)

    # 1) f32 MXU path, streamed weights (tn=256 -> 2 vocab tiles, exercises the
    #    online-softmax cross-tile rescale).
    out = generator_forward(x, w_t, b, tn=256, compute_dtype=jnp.float32)
    out = jax.block_until_ready(out)
    assert out.shape == (batch, seq, vocab)
    assert jnp.allclose(out, ref, atol=1e-3, rtol=1e-2)
    assert jnp.allclose(jnp.sum(out, axis=-1), 1.0, atol=1e-3)

    # 2) default path: bf16 MXU operands, f32 probabilities, auto tiles.
    out_def = generator_forward(x, w_t, b)
    out_def = jax.block_until_ready(out_def)
    assert out_def.shape == (batch, seq, vocab)
    assert jnp.allclose(out_def, ref, atol=5e-3, rtol=5e-2)
    assert jnp.allclose(jnp.sum(out_def, axis=-1), 1.0, atol=1e-2)

    # 3) bf16 MXU + bf16 probabilities, 4 vocab tiles.
    out_bf16 = generator_forward(x, w_t, b, tn=128, out_dtype=jnp.bfloat16)
    out_bf16 = jax.block_until_ready(out_bf16)
    assert out_bf16.shape == (batch, seq, vocab)
    assert jnp.allclose(out_bf16.astype(jnp.float32), ref, atol=5e-3, rtol=5e-2)
    assert jnp.allclose(jnp.sum(out_bf16.astype(jnp.float32), axis=-1), 1.0, atol=2e-2)

    print("KERNEL_OK")
</pallas_src>

<mosaic_0001>
module attributes {stable_mosaic.version = 11 : i64} {
  func.func @generator_kernel(%arg0: i32, %arg1: i32, %arg2: memref<16x128xf32, #tpu.memory_space<vmem>>, %arg3: memref<128x256xf32, #tpu.memory_space<vmem>>, %arg4: memref<1x256xf32, #tpu.memory_space<vmem>>, %arg5: memref<16x512xf32, #tpu.memory_space<vmem>>, %arg6: memref<16x1xf32, #tpu.memory_space<vmem>>, %arg7: memref<16x1xf32, #tpu.memory_space<vmem>>, %arg8: memref<2x16x1xf32, #tpu.memory_space<vmem>>) attributes {dimension_semantics = [#tpu.dimension_semantics<parallel>, #tpu.dimension_semantics<arbitrary>], iteration_bounds = array<i64: 1, 2>, scalar_prefetch = 0 : i64, scratch_operands = 3 : i64, tpu.core_type = #tpu.core_type<tc>, window_params = [{transform_indices = @transform_0, window_bounds = array<i64: 16, 128>}, {transform_indices = @transform_1, window_bounds = array<i64: 128, 256>}, {transform_indices = @transform_2, window_bounds = array<i64: 1, 256>}, {transform_indices = @transform_3, window_bounds = array<i64: 16, 512>}]} {
    %c0_i32 = arith.constant 0 : i32
    %0 = arith.cmpi eq, %arg1, %c0_i32 : i32
    %1 = arith.extui %0 : i1 to i32
    %c0_i32_0 = arith.constant 0 : i32
    %2 = arith.cmpi ne, %1, %c0_i32_0 : i32
    scf.if %2 {
      %cst_20 = arith.constant 0xFF800000 : f32
      %36 = vector.broadcast %cst_20 : f32 to vector<16x1xf32>
      %c0_21 = arith.constant 0 : index
      %c0_22 = arith.constant 0 : index
      %37 = vector.load %arg6[%c0_21, %c0_22] : memref<16x1xf32, #tpu.memory_space<vmem>>, vector<16x1xf32>
      tpu.vector_store %arg6[%c0_21, %c0_22], %36 {strides = array<i32>} : memref<16x1xf32, #tpu.memory_space<vmem>>, vector<16x1xf32>,
      %cst_23 = arith.constant 0.000000e+00 : f32
      %38 = vector.broadcast %cst_23 : f32 to vector<16x1xf32>
      %c0_24 = arith.constant 0 : index
      %c0_25 = arith.constant 0 : index
      %39 = vector.load %arg7[%c0_24, %c0_25] : memref<16x1xf32, #tpu.memory_space<vmem>>, vector<16x1xf32>
      tpu.vector_store %arg7[%c0_24, %c0_25], %38 {strides = array<i32>} : memref<16x1xf32, #tpu.memory_space<vmem>>, vector<16x1xf32>,
    } else {
    }
    %c0 = arith.constant 0 : index
    %c0_1 = arith.constant 0 : index
    %3 = vector.load %arg2[%c0, %c0_1] : memref<16x128xf32, #tpu.memory_space<vmem>>, vector<16x128xf32>
    %c0_2 = arith.constant 0 : index
    %c0_3 = arith.constant 0 : index
    %4 = vector.load %arg3[%c0_2, %c0_3] : memref<128x256xf32, #tpu.memory_space<vmem>>, vector<128x256xf32>
    %cst = arith.constant dense<0.000000e+00> : vector<16x256xf32>
    %5 = tpu.matmul %3, %4, %cst {dimension_numbers = #tpu.dot_dimension_numbers<[1], [0], [0], [1], [0, 0, 1, 1], [], []>} : vector<16x128xf32>, vector<128x256xf32>, vector<16x256xf32> -> vector<16x256xf32>
    %c0_4 = arith.constant 0 : index
    %c0_5 = arith.constant 0 : index
    %6 = vector.load %arg4[%c0_4, %c0_5] : memref<1x256xf32, #tpu.memory_space<vmem>>, vector<1x256xf32>
    %7 = vector.broadcast %6 : vector<1x256xf32> to vector<16x256xf32>
    %8 = arith.addf %5, %7 : vector<16x256xf32>
    %c0_6 = arith.constant 0 : index
    %c0_7 = arith.constant 0 : index
    %9 = vector.load %arg6[%c0_6, %c0_7] : memref<16x1xf32, #tpu.memory_space<vmem>>, vector<16x1xf32>
    %cst_8 = arith.constant dense<0xFF800000> : vector<16xf32>
    %10 = vector.multi_reduction <maximumf>, %8, %cst_8 [1] : vector<16x256xf32> to vector<16xf32>
    %11 = vector.shape_cast %10 : vector<16xf32> to vector<16x1xf32>
    %12 = arith.maximumf %9, %11 : vector<16x1xf32>
    %13 = vector.broadcast %12 : vector<16x1xf32> to vector<16x256xf32>
    %14 = arith.subf %8, %13 : vector<16x256xf32>
    %15 = math.exp %14 : vector<16x256xf32>
    %c0_9 = arith.constant 0 : index
    %c0_10 = arith.constant 0 : index
    %16 = vector.load %arg7[%c0_9, %c0_10] : memref<16x1xf32, #tpu.memory_space<vmem>>, vector<16x1xf32>
    %17 = arith.subf %9, %12 : vector<16x1xf32>
    %18 = math.exp %17 : vector<16x1xf32>
    %19 = arith.mulf %16, %18 : vector<16x1xf32>
    %cst_11 = arith.constant dense<0.000000e+00> : vector<16xf32>
    %20 = vector.multi_reduction <add>, %15, %cst_11 [1] : vector<16x256xf32> to vector<16xf32>
    %21 = vector.shape_cast %20 : vector<16xf32> to vector<16x1xf32>
    %22 = arith.addf %19, %21 : vector<16x1xf32>
    %c0_12 = arith.constant 0 : index
    %c0_13 = arith.constant 0 : index
    %23 = vector.load %arg7[%c0_12, %c0_13] : memref<16x1xf32, #tpu.memory_space<vmem>>, vector<16x1xf32>
    tpu.vector_store %arg7[%c0_12, %c0_13], %22 {strides = array<i32>} : memref<16x1xf32, #tpu.memory_space<vmem>>, vector<16x1xf32>,
    %c0_14 = arith.constant 0 : index
    %c0_15 = arith.constant 0 : index
    %24 = vector.load %arg6[%c0_14, %c0_15] : memref<16x1xf32, #tpu.memory_space<vmem>>, vector<16x1xf32>
    tpu.vector_store %arg6[%c0_14, %c0_15], %12 {strides = array<i32>} : memref<16x1xf32, #tpu.memory_space<vmem>>, vector<16x1xf32>,
    %25 = arith.index_cast %arg1 : i32 to index
    %c0_16 = arith.constant 0 : index
    %c0_17 = arith.constant 0 : index
    %26 = vector.load %arg8[%25, %c0_16, %c0_17] : memref<2x16x1xf32, #tpu.memory_space<vmem>>, vector<1x16x1xf32>
    %27 = vector.shape_cast %26 : vector<1x16x1xf32> to vector<16x1xf32>
    %28 = vector.shape_cast %12 : vector<16x1xf32> to vector<1x16x1xf32>
    tpu.vector_store %arg8[%25, %c0_16, %c0_17], %28 {strides = array<i32>} : memref<2x16x1xf32, #tpu.memory_space<vmem>>, vector<1x16x1xf32>,
    %c256_i32 = arith.constant 256 : i32
    %29 = arith.muli %arg1, %c256_i32 : i32
    %30 = tpu.assume_multiple %29, 256 : i32
    %c0_18 = arith.constant 0 : index
    %31 = arith.index_cast %30 : i32 to index
    %32 = vector.load %arg5[%c0_18, %31] : memref<16x512xf32, #tpu.memory_space<vmem>>, vector<16x256xf32>
    tpu.vector_store %arg5[%c0_18, %31], %15 {strides = array<i32>} : memref<16x512xf32, #tpu.memory_space<vmem>>, vector<16x256xf32>,
    %c1_i32 = arith.constant 1 : i32
    %33 = arith.cmpi eq, %arg1, %c1_i32 : i32
    %34 = arith.extui %33 : i1 to i32
    %c0_i32_19 = arith.constant 0 : i32
    %35 = arith.cmpi ne, %34, %c0_i32_19 : i32
    scf.if %35 {
      %c0_20 = arith.constant 0 : index
      %c0_21 = arith.constant 0 : index
      %36 = vector.load %arg7[%c0_20, %c0_21] : memref<16x1xf32, #tpu.memory_space<vmem>>, vector<16x1xf32>
      %37 = tpu.reciprocal %36 : vector<16x1xf32> -> vector<16x1xf32>
      %c0_22 = arith.constant 0 : index
      %c0_23 = arith.constant 0 : index
      %38 = vector.load %arg6[%c0_22, %c0_23] : memref<16x1xf32, #tpu.memory_space<vmem>>, vector<16x1xf32>
      %c0_24 = arith.constant 0 : index
      %c0_25 = arith.constant 0 : index
      %c0_26 = arith.constant 0 : index
      %39 = vector.load %arg8[%c0_24, %c0_25, %c0_26] : memref<2x16x1xf32, #tpu.memory_space<vmem>>, vector<1x16x1xf32>
      %40 = vector.shape_cast %39 : vector<1x16x1xf32> to vector<16x1xf32>
      %41 = arith.subf %40, %38 : vector<16x1xf32>
      %42 = math.exp %41 : vector<16x1xf32>
      %43 = arith.mulf %42, %37 : vector<16x1xf32>
      %c0_27 = arith.constant 0 : index
      %c0_28 = arith.constant 0 : index
      %44 = vector.load %arg5[%c0_27, %c0_28] : memref<16x512xf32, #tpu.memory_space<vmem>>, vector<16x256xf32>
      %45 = vector.broadcast %43 : vector<16x1xf32> to vector<16x256xf32>
      %46 = arith.mulf %44, %45 : vector<16x256xf32>
      %c0_29 = arith.constant 0 : index
      %c0_30 = arith.constant 0 : index
      %47 = vector.load %arg5[%c0_29, %c0_30] : memref<16x512xf32, #tpu.memory_space<vmem>>, vector<16x256xf32>
      tpu.vector_store %arg5[%c0_29, %c0_30], %46 {strides = array<i32>} : memref<16x512xf32, #tpu.memory_space<vmem>>, vector<16x256xf32>,
      %c1 = arith.constant 1 : index
      %c0_31 = arith.constant 0 : index
      %c0_32 = arith.constant 0 : index
      %48 = vector.load %arg8[%c1, %c0_31, %c0_32] : memref<2x16x1xf32, #tpu.memory_space<vmem>>, vector<1x16x1xf32>
      %49 = vector.shape_cast %48 : vector<1x16x1xf32> to vector<16x1xf32>
      %50 = arith.subf %49, %38 : vector<16x1xf32>
      %51 = math.exp %50 : vector<16x1xf32>
      %52 = arith.mulf %51, %37 : vector<16x1xf32>
      %c0_33 = arith.constant 0 : index
      %c256 = arith.constant 256 : index
      %53 = vector.load %arg5[%c0_33, %c256] : memref<16x512xf32, #tpu.memory_space<vmem>>, vector<16x256xf32>
      %54 = vector.broadcast %52 : vector<16x1xf32> to vector<16x256xf32>
      %55 = arith.mulf %53, %54 : vector<16x256xf32>
      %c0_34 = arith.constant 0 : index
      %c256_35 = arith.constant 256 : index
      %56 = vector.load %arg5[%c0_34, %c256_35] : memref<16x512xf32, #tpu.memory_space<vmem>>, vector<16x256xf32>
      tpu.vector_store %arg5[%c0_34, %c256_35], %55 {strides = array<i32>} : memref<16x512xf32, #tpu.memory_space<vmem>>, vector<16x256xf32>,
    } else {
    }
    return
  }
  func.func @transform_0(%arg0: i32, %arg1: i32) -> (i32, i32) {
    %c0_i32 = arith.constant 0 : i32
    %c0_i32_0 = arith.constant 0 : i32
    return %arg0, %c0_i32 : i32, i32
  }
  func.func @transform_1(%arg0: i32, %arg1: i32) -> (i32, i32) {
    %c0_i32 = arith.constant 0 : i32
    %c0_i32_0 = arith.constant 0 : i32
    return %c0_i32, %arg1 : i32, i32
  }
  func.func @transform_2(%arg0: i32, %arg1: i32) -> (i32, i32) {
    %c0_i32 = arith.constant 0 : i32
    %c0_i32_0 = arith.constant 0 : i32
    return %c0_i32, %arg1 : i32, i32
  }
  func.func @transform_3(%arg0: i32, %arg1: i32) -> (i32, i32) {
    %c0_i32 = arith.constant 0 : i32
    %c0_i32_0 = arith.constant 0 : i32
    return %arg0, %c0_i32 : i32, i32
  }
}

</mosaic_0001>

<bundles_post_ra>
// kernel: tpu_custom_call.1
= control target key start
LH: loop header
LB: loop body
LE: loop exit
PB: predicated region body
PF: predicated region fallthrough
CT: control target
= control target key end

     0   :  { %8 = vsyncpa [#allocation6], 0  ;;  %s1203_s0 = inlined_call_operand.hbm [shape: f32[16,128], index: 0, kind: input, shape index: {}]   ;;  %s1204_s1 = inlined_call_operand.hbm [shape: f32[128,512], index: 1, kind: input, shape index: {}]   ;;  %s1205_s2 = inlined_call_operand.hbm [shape: f32[1,512], index: 2, kind: input, shape index: {}]   ;;  %s1206_s3 = inlined_call_operand.hbm [shape: f32[16,512], index: 3, kind: output, shape index: {}]  }
   0x1   :  { %9 = vsyncpa [#allocation9], 0 }
   0x2   :  { %11 = vsyncpa [#allocation9 + $0x1], 0 }
   0x3   :  { %12 = vsyncpa [#allocation7], 0  ;;  %s1022_s12 = smov 0   ;;  %s1024_s13 = smov 0  }
   0x4   :  { %s1026_s14 = smov 0   ;;  %s1028_s15 = smov 0  }
   0x5   :  { %s1030_s16 = smov 0   ;;  %s1032_s17 = smov 0  }
   0x6 LB: > { %s27_s18 = sadd.s32 1, %s983_s16  ;;  %s63_s19 = sadd.s32 1, %s975_s14  ;;  %s987_s17 = sphi %s1032_s17, %s18_s17   ;;  %s983_s16 = sphi %s1030_s16, %s1215_s16   ;;  %s979_s15 = sphi %s1028_s15, %s1214_s15   ;;  %s975_s14 = sphi %s1026_s14, %s1213_s14   ;;  %s971_s13 = sphi %s1024_s13, %s1212_s13   ;;  %s967_s12 = sphi %s1022_s12, %s1211_s12  }
   0x7   : > { %p28_p0 = scmp.ge.s32.totalorder %s27_s18, 2  ;;  %p70_p1 = scmp.ne.s32.totalorder %s975_s14, %s971_s13 }
   0x8   : > { %p71_p2 = scmp.eq.s32.totalorder %s987_s17, 0  ;;  %p718_p4 = scmp.lt.s32.totalorder %s987_s17, 2 }
   0x9   : > { %s1217_s18 = smov (%p28_p0, %s27_s18), 0  ;;  %s169_s22 = sand.u32 1, %s987_s17  }
   0xa   : > { %p1059_p3 = por %p71_p2, %p70_p1  ;;  %s60_s21 = ssub.s32 %s983_s16, %s1217_s18 }
   0xb   : > { %p61_p5 = scmp.eq.s32.totalorder %s60_s21, 0  ;;  %s171_s23 = sand.u32 1, %s975_s14  }
   0xc   : > { %s661_s24 = sshll.u32 %s983_s16, 4  ;;  %s643_s26 = sshll.u32 %s171_s23, 8 }
   0xd   : > { %s1070_s25 = scalar_select %p61_p5, %s975_s14, %s63_s19  }
   0xe   : > { %s178_s29 = scalar_lea.hbm %s1204_s1, %s661_s24  ;;  %s173_s4 = scalar_lea.vmem [#allocation8], %s643_s26 }
   0xf   : > { %s179_s30 = sshll.u32 %s178_s29, 4  ;;  %s181_s5 = sshll.u32 %s173_s4, 4  ;;  %s180_s30 = int_to_ptr.hbm [resolvable:$true] %s179_s30  ;;  %s182_s5 = int_to_ptr.vmem [resolvable:$true] %s181_s5 }
  0x10   : > { %p1079_p6 = pnand %p718_p4, %p1059_p3  ;;  %s1083_s7 = scalar_lea.sflag [#allocation9], %s169_s22 }
  0x11   : > { %s989_s8 = smov 512   ;;  %s990_s9 = smov 256  }
  0x12   : > { %s991_s10 = smov 16   ;;  %s1089_s11 = sadd.s32 4294967295, %s987_s17  }
  0x13   : > { %713 = dma.hbm_to_vmem [thread:$0]  (!%p1079_p6), %s180_s30, 4096, %s182_s5, %s1083_s7, %s989_s8, %s990_s9, %s991_s10  }
  0x14   : > { %p76_p7 = scmp.ne.s32.totalorder %s971_s13, %s967_s12  ;;  %p77_p8 = scmp.eq.s32.totalorder %s1089_s11, 0 }
  0x15   : > { %p640_p9 = scmp.ge.s32.totalorder %s987_s17, 1  ;;  %p139_p10 = scmp.lt.s32.totalorder %s987_s17, 3 }
  0x16   : > { %p1098_p11 = por %p77_p8, %p76_p7  ;;  %s153_s22 = sshll.u32 %s1203_s0, 4  ;;  %s154_s22 = int_to_ptr.hbm [resolvable:$true] %s153_s22 }
  0x17   : > { %p1105_p12 = pnand %p640_p9, %p139_p10  ;;  %s992_s12 = smov [#allocation5]  }
  0x18   : > { %s155_s26 = sshll.u32 %s992_s12, 4  ;;  %s646_s27 = sshll.u32 %s171_s23, 1  ;;  %s156_s26 = int_to_ptr.vmem [resolvable:$true] %s155_s26 }
  0x19   : > { %p706_p13 = pneg %p1105_p12  ;;  %s647_s28 = sshll.u32 %s983_s16, 1 }
  0x1a   : > { %s199_s4 = scalar_lea.hbm %s1205_s2, %s647_s28  ;;  %s993_s5 = smov 128  }
  0x1b   : > { %p707_p0 = pnand %p706_p13, %p77_p8  ;;  %s994_s8 = smov 8  }
  0x1c   : > { %s201_s9 = sshll.u32 %s199_s4, 4  ;;  %s195_s10 = scalar_lea.vmem [#allocation10], %s646_s27  ;;  %s202_s9 = int_to_ptr.hbm [resolvable:$true] %s201_s9 }
  0x1d   : > { %709 = dma.hbm_to_vmem [thread:$0]  (!%p707_p0), %s154_s22, 256, %s156_s26, [#allocation6], %s993_s5, %s993_s5, %s994_s8  }
  0x1e   : > { %s203_s20 = sshll.u32 %s195_s10, 4  ;;  %212 = sbr.rel (%p1105_p12) target bundleno = 743 (0x2e7), region = 32  ;;  %s204_s20 = int_to_ptr.vmem [resolvable:$true] %s203_s20 }
  0x1f   : > { %716 = dma.hbm_to_vmem [thread:$0]  (!%p1079_p6), %s202_s9, 32, %s204_s20, %s1083_s7  }
  0x23   : > { %954 = dma.done.wait (%p77_p8), [#allocation6], 256  }
  0x24   : > { %956 = vsyncadd (%p77_p8), [#allocation6], 4294967040  ;;  %s219_s23 = sand.u32 1, %s1089_s11   ;;  %s221_s21 = sand.u32 1, %s971_s13  }
  0x25   : > { %s650_s22 = sshll.u32 %s221_s21, 8  ;;  %s220_s12 = scalar_lea.sflag [#allocation9], %s219_s23 }
  0x26   : > { %s1128_s26 = scalar_lea.vmem [#allocation8], %s650_s22 }
  0x27   : > { %958 = dma.done.wait (%p1098_p11), %s220_s12, 4128  }
  0x28   : > { %960 = vsyncadd (%p1098_p11), %s220_s12, 4294963168  ;;  %s1134_s6 = sshll.u32 %s221_s21, 1  ;;  %p652_p1 = scmp.ne.s32.totalorder %s979_s15, 0 }
  0x29   : > { %s233_s7 = scalar_lea.vmem [#allocation10], %s1134_s6 }
  0x2a   : > { %264 = sbr.rel (%p652_p1) target bundleno = 52 (0x34), region = 48 }
  0x2f   : > { %vm265_vm0 = vcmask 7168   ;;  %v995_v0 = vmov -inf   ;;  %v996_v1 = vmov 0.0  }
  0x30   : > { %266 = vst.msk [vmem:[#allocation2] sm:$0xff] %vm265_vm0, %v995_v0 }
  0x31   : > { %267 = vst.msk [vmem:[#allocation2 + $0x8] sm:$0xff] %vm265_vm0, %v995_v0 }
  0x32   : > { %268 = vst.msk [vmem:[#allocation3] sm:$0xff] %vm265_vm0, %v996_v1 }
  0x33   : > { %269 = vst.msk [vmem:[#allocation3 + $0x8] sm:$0xff] %vm265_vm0, %v996_v1 }
  0x34 PF: > { %v302_v2 = vld [vmem:[%s1128_s26 + $0xf0] sm:$0xff]  ;;  %v303_v3 = vld [vmem:[%s1128_s26 + $0xf8] sm:$0xff]  ;;  %v300_v4 = vld [vmem:[%s1128_s26 + $0xe0] sm:$0xff]  ;;  %v997_v49 = vmov 0   ;;  %s653_s19 = sshll.u32 %s979_s15, 4  ;;  %vm406_vm1 = vcmask 7168  }
  0x35   : > { %310 = vmatpush.msra.mxu0 %v302_v2  ;;  %333 = vmatpush.msra.mxu1 %v303_v3  ;;  %v301_v5 = vld [vmem:[%s1128_s26 + $0xe8] sm:$0xff]  ;;  %v298_v6 = vld [vmem:[%s1128_s26 + $0xd0] sm:$0xff]  ;;  %v299_v7 = vld [vmem:[%s1128_s26 + $0xd8] sm:$0xff]  ;;  %s412_s24 = scalar_lea.vmem [#allocation4], %s653_s19  ;;  %s654_s27 = sshll.u32 %s979_s15, 8 }
  0x36   : > { %662 = vmatpush.msra.mxu2 %v302_v2  ;;  %678 = vmatpush.msra.mxu3 %v303_v3  ;;  %v296_v8 = vld [vmem:[%s1128_s26 + $0xc0] sm:$0xff]  ;;  %v297_v9 = vld [vmem:[%s1128_s26 + $0xc8] sm:$0xff]  ;;  %v294_v10 = vld [vmem:[%s1128_s26 + $0xb0] sm:$0xff]  ;;  %s416_s28 = sshra.s32 %s654_s27, 7  ;;  %p656_p2 = scmp.ne.s32.totalorder %s979_s15, 1 }
  0x37   : > { %311 = vmatpush.msra.mxu0 %v300_v4  ;;  %334 = vmatpush.msra.mxu1 %v301_v5  ;;  %v295_v11 = vld [vmem:[%s1128_s26 + $0xb8] sm:$0xff]  ;;  %v292_v12 = vld [vmem:[%s1128_s26 + $0xa0] sm:$0xff]  ;;  %v293_v13 = vld [vmem:[%s1128_s26 + $0xa8] sm:$0xff]  ;;  %s655_s29 = sshll.u32 %s416_s28, 3 }
  0x38   : > { %663 = vmatpush.msra.mxu2 %v300_v4  ;;  %679 = vmatpush.msra.mxu3 %v301_v5  ;;  %v290_v14 = vld [vmem:[%s1128_s26 + $0x90] sm:$0xff]  ;;  %v291_v15 = vld [vmem:[%s1128_s26 + $0x98] sm:$0xff]  ;;  %v288_v16 = vld [vmem:[%s1128_s26 + $0x80] sm:$0xff]  ;;  %s419_s30 = scalar_lea.vmem [#allocation11], %s655_s29 }
  0x39   : > { %312 = vmatpush.msra.mxu0 %v298_v6  ;;  %335 = vmatpush.msra.mxu1 %v299_v7  ;;  %v289_v17 = vld [vmem:[%s1128_s26 + $0x88] sm:$0xff]  ;;  %v286_v18 = vld [vmem:[%s1128_s26 + $0x70] sm:$0xff]  ;;  %v287_v19 = vld [vmem:[%s1128_s26 + $0x78] sm:$0xff] }
  0x3a   : > { %664 = vmatpush.msra.mxu2 %v298_v6  ;;  %680 = vmatpush.msra.mxu3 %v299_v7  ;;  %v284_v20 = vld [vmem:[%s1128_s26 + $0x60] sm:$0xff]  ;;  %v285_v21 = vld [vmem:[%s1128_s26 + $0x68] sm:$0xff]  ;;  %v282_v22 = vld [vmem:[%s1128_s26 + $0x50] sm:$0xff] }
  0x3b   : > { %313 = vmatpush.msra.mxu0 %v296_v8  ;;  %336 = vmatpush.msra.mxu1 %v297_v9  ;;  %v283_v23 = vld [vmem:[%s1128_s26 + $0x58] sm:$0xff]  ;;  %v280_v24 = vld [vmem:[%s1128_s26 + $0x40] sm:$0xff]  ;;  %v281_v25 = vld [vmem:[%s1128_s26 + $0x48] sm:$0xff] }
  0x3c   : > { %665 = vmatpush.msra.mxu2 %v296_v8  ;;  %681 = vmatpush.msra.mxu3 %v297_v9  ;;  %v278_v26 = vld [vmem:[%s1128_s26 + $0x30] sm:$0xff]  ;;  %v279_v27 = vld [vmem:[%s1128_s26 + $0x38] sm:$0xff]  ;;  %v276_v28 = vld [vmem:[%s1128_s26 + $0x20] sm:$0xff] }
  0x3d   : > { %314 = vmatpush.msra.mxu0 %v294_v10  ;;  %337 = vmatpush.msra.mxu1 %v295_v11  ;;  %v277_v29 = vld [vmem:[%s1128_s26 + $0x28] sm:$0xff]  ;;  %v274_v30 = vld [vmem:[%s1128_s26 + $0x10] sm:$0xff]  ;;  %v275_v31 = vld [vmem:[%s1128_s26 + $0x18] sm:$0xff] }
  0x3e   : > { %666 = vmatpush.msra.mxu2 %v294_v10  ;;  %682 = vmatpush.msra.mxu3 %v295_v11  ;;  %v272_v32 = vld [vmem:[%s1128_s26] sm:$0xff]  ;;  %v273_v33 = vld [vmem:[%s1128_s26 + $0x8] sm:$0xff]  ;;  %v270_v34 = vld [vmem:[#allocation5] sm:$0xff] }
  0x3f   : > { %315 = vmatpush.msra.mxu0 %v292_v12  ;;  %338 = vmatpush.msra.mxu1 %v293_v13  ;;  %v271_v35 = vld [vmem:[#allocation5 + $0x8] sm:$0xff]  ;;  %v304_v36 = vld [vmem:[%s233_s7] sm:$0x3]  ;;  %v356_v50 = vld [vmem:[#allocation2] sm:$0xff] }
  0x40   : > { %667 = vmatpush.msra.mxu2 %v292_v12  ;;  %683 = vmatpush.msra.mxu3 %v293_v13  ;;  %v306_v37 = vperm.slane %v304_v36, 0  ;;  %v307_v38 = vperm.slane %v304_v36, 1  ;;  %v357_v54 = vld [vmem:[#allocation2 + $0x8] sm:$0xff]  ;;  %v388_v13 = vld [vmem:[#allocation3] sm:$0xff] }
  0x41   : > { %316 = vmatpush.msra.mxu0 %v290_v14  ;;  %339 = vmatpush.msra.mxu1 %v291_v15 }
  0x42   : > { %668 = vmatpush.msra.mxu2 %v290_v14  ;;  %684 = vmatpush.msra.mxu3 %v291_v15 }
  0x43   : > { %317 = vmatpush.msra.mxu0 %v288_v16  ;;  %340 = vmatpush.msra.mxu1 %v289_v17 }
  0x44   : > { %669 = vmatpush.msra.mxu2 %v288_v16  ;;  %685 = vmatpush.msra.mxu3 %v289_v17 }
  0x45   : > { %318 = vmatpush.msra.mxu0 %v286_v18  ;;  %341 = vmatpush.msra.mxu1 %v287_v19 }
  0x46   : > { %670 = vmatpush.msra.mxu2 %v286_v18  ;;  %686 = vmatpush.msra.mxu3 %v287_v19  ;;  %v389_v18 = vld [vmem:[#allocation3 + $0x8] sm:$0xff] }
  0x47   : > { %319 = vmatpush.msra.mxu0 %v284_v20  ;;  %342 = vmatpush.msra.mxu1 %v285_v21 }
  0x48   : > { %671 = vmatpush.msra.mxu2 %v284_v20  ;;  %687 = vmatpush.msra.mxu3 %v285_v21 }
  0x49   : > { %320 = vmatpush.msra.mxu0 %v282_v22  ;;  %343 = vmatpush.msra.mxu1 %v283_v23 }
  0x4a   : > { %672 = vmatpush.msra.mxu2 %v282_v22  ;;  %688 = vmatpush.msra.mxu3 %v283_v23 }
  0x4b   : > { %321 = vmatpush.msra.mxu0 %v280_v24  ;;  %344 = vmatpush.msra.mxu1 %v281_v25 }
  0x4c   : > { %673 = vmatpush.msra.mxu2 %v280_v24  ;;  %689 = vmatpush.msra.mxu3 %v281_v25 }
  0x4d   : > { %322 = vmatpush.msra.mxu0 %v278_v26  ;;  %345 = vmatpush.msra.mxu1 %v279_v27 }
  0x4e   : > { %674 = vmatpush.msra.mxu2 %v278_v26  ;;  %690 = vmatpush.msra.mxu3 %v279_v27 }
  0x4f   : > { %323 = vmatpush.msra.mxu0 %v276_v28  ;;  %346 = vmatpush.msra.mxu1 %v277_v29 }
  0x50   : > { %675 = vmatpush.msra.mxu2 %v276_v28  ;;  %691 = vmatpush.msra.mxu3 %v277_v29 }
  0x51   : > { %324 = vmatpush.msra.mxu0 %v274_v30  ;;  %347 = vmatpush.msra.mxu1 %v275_v31 }
  0x52   : > { %676 = vmatpush.msra.mxu2 %v274_v30  ;;  %692 = vmatpush.msra.mxu3 %v275_v31 }
  0x53   : > { %325 = vmatpush.msra.mxu0 %v272_v32  ;;  %348 = vmatpush.msra.mxu1 %v273_v33 }
  0x54   : > { %326 = vmatmul.f32.vlgmr.msra.gmra.mxu0 %v270_v34  ;;  %349 = vmatmul.f32.vlgmr.msra.gmra.mxu1 %v270_v34 }
  0x55   : > { %677 = vmatpush.msra.mxu2 %v272_v32  ;;  %693 = vmatpush.msra.mxu3 %v273_v33 }
  0x56   : > { %329 = vmatmul.f32.vlgmr.msra.gmra.mxu2 %v271_v35  ;;  %352 = vmatmul.f32.vlgmr.msra.gmra.mxu3 %v271_v35 }
  0x57   : > { %783 = vset.pattern.permute.xlu1 %v997_v49  ;;  %784 = vset.pattern.permute.xlu0 %v997_v49 }
  0xd1   : > { %v327_v39 = vpop.f32.mrf.mxu0  ;;  %v350_v40 = vpop.f32.mrf.mxu1 }
  0xd2   : > { %v328_v41 = vadd.f32 %v327_v39, %v306_v37  ;;  %v351_v42 = vadd.f32 %v350_v40, %v307_v38 }
  0xd4   : > { %v358_v43 = vmax.f32 %v328_v41, %v351_v42 }
  0xd6   : > { %359 = vmax.xlane.f32.xlu0 %v358_v43 }
  0xd9   : > { %v330_v44 = vpop.f32.mrf.mxu2  ;;  %v353_v45 = vpop.f32.mrf.mxu3 }
  0xda   : > { %v331_v46 = vadd.f32 %v330_v44, %v306_v37  ;;  %v354_v47 = vadd.f32 %v353_v45, %v307_v38 }
  0xdc   : > { %v361_v48 = vmax.f32 %v331_v46, %v354_v47 }
  0xde   : > { %362 = vmax.xlane.f32.xlu0 %v361_v48 }
 0x149   : > { %v360_v51 = vpop.xlane.xlu0 %359 }
 0x14a   : > { %v364_v52 = vmax.f32 %v356_v50, %v360_v51 }
 0x14c   : > { %v390_v53 = vsub.f32 %v356_v50, %v364_v52  ;;  %409 = vst.msk [vmem:[#allocation2] sm:$0xff] %vm406_vm1, %v364_v52  ;;  %368 = vperm.xlu1 %783, %v364_v52  }
 0x14d   : > { %413 = vst.msk [vmem:[%s412_s24] sm:$0xff] %vm406_vm1, %v364_v52 }
 0x14e   : > { %v392_v10 = vmul.f32 1.442695, %v390_v53 }
 0x151   : > { %v363_v55 = vpop.xlane.xlu0 %362 }
 0x152   : > { %v365_v56 = vmax.f32 %v357_v54, %v363_v55 }
 0x154   : > { %v391_v57 = vsub.f32 %v357_v54, %v365_v56  ;;  %410 = vst.msk [vmem:[#allocation2 + $0x8] sm:$0xff] %vm406_vm1, %v365_v56  ;;  %373 = vperm.xlu1 %783, %v365_v56  }
 0x155   : > { %414 = vst.msk [vmem:[%s412_s24 + $0x8] sm:$0xff] %vm406_vm1, %v365_v56 }
 0x156   : > { %v394_v11 = vmul.f32 1.442695, %v391_v57 }
 0x1be   : > { %v369_v58 = vpop.permute.xlu1 %368 }
 0x1bf   : > { %v376_v59 = vsub.f32 %v328_v41, %v369_v58  ;;  %v377_v60 = vsub.f32 %v351_v42, %v369_v58 }
 0x1c1   : > { %v380_v61 = vmul.f32 1.442695, %v376_v59  ;;  %v382_v62 = vmul.f32 1.442695, %v377_v60 }
 0x1c3   : > { %785 = vpow2.f32 %v380_v61 }
 0x1c4   : > { %787 = vpow2.f32 %v382_v62 }
 0x1c6   : > { %v374_v63 = vpop.permute.xlu1 %373 }
 0x1c7   : > { %v378_v0 = vsub.f32 %v331_v46, %v374_v63  ;;  %v379_v1 = vsub.f32 %v354_v47, %v374_v63 }
 0x1c9   : > { %v786_v2 = vpop.eup %785  ;;  %v384_v3 = vmul.f32 1.442695, %v378_v0  ;;  %v386_v4 = vmul.f32 1.442695, %v379_v1 }
 0x1ca   : > { %v788_v5 = vpop.eup %787  ;;  %420 = vst [vmem:[%s419_s30] sm:$0xff] %v786_v2 }
 0x1cb   : > { %421 = vst [vmem:[%s419_s30 + $0x8] sm:$0xff] %v788_v5  ;;  %789 = vpow2.f32 %v384_v3  ;;  %v398_v6 = vadd.f32 %v788_v5, %v786_v2 }
 0x1cc   : > { %791 = vpow2.f32 %v386_v4 }
 0x1cd   : > { %399 = vadd.xlane.f32.xlu2 %v398_v6  ;;  %793 = vpow2.f32 %v392_v10 }
 0x1ce   : > { %795 = vpow2.f32 %v394_v11 }
 0x1d1   : > { %v790_v7 = vpop.eup %789 }
 0x1d2   : > { %v792_v8 = vpop.eup %791  ;;  %422 = vst [vmem:[%s419_s30 + $0x20] sm:$0xff] %v790_v7 }
 0x1d3   : > { %423 = vst [vmem:[%s419_s30 + $0x28] sm:$0xff] %v792_v8  ;;  %v401_v9 = vadd.f32 %v792_v8, %v790_v7  ;;  %v794_v12 = vpop.eup %793 }
 0x1d4   : > { %v396_v14 = vmul.f32 %v794_v12, %v388_v13  ;;  %v796_v17 = vpop.eup %795 }
 0x1d5   : > { %402 = vadd.xlane.f32.xlu2 %v401_v9  ;;  %v397_v19 = vmul.f32 %v796_v17, %v389_v18 }
 0x240   : > { %v400_v15 = vpop.xlane.xlu2 %399 }
 0x241   : > { %v404_v16 = vadd.f32 %v400_v15, %v396_v14 }
 0x243   : > { %407 = vst.msk [vmem:[#allocation3] sm:$0xff] %vm406_vm1, %v404_v16 }
 0x247   : > { %427 = sbr.rel (%p656_p2) target bundleno = 737 (0x2e1), region = 52 }
 0x248   : > { %v403_v20 = vpop.xlane.xlu2 %402 }
 0x249   : > { %v405_v21 = vadd.f32 %v403_v20, %v397_v19 }
 0x24b   : > { %408 = vst.msk [vmem:[#allocation3 + $0x8] sm:$0xff] %vm406_vm1, %v405_v21 }
 0x24c   : > { %v428_v22 = vld [vmem:[#allocation3] sm:$0xff]  ;;  %v458_v23 = vld [vmem:[#allocation2] sm:$0xff]  ;;  %v998_v25 = vmov 0   ;;  %v459_v30 = vld [vmem:[#allocation2 + $0x8] sm:$0xff] }
 0x24d   : > { %v493_v24 = vld [vmem:[#allocation4 + $0x10] sm:$0xff]  ;;  %798 = vset.pattern.permute.xlu1 %v998_v25  ;;  %797 = vset.pattern.permute.xlu0 %v998_v25  ;;  %799 = vrcp.f32 %v428_v22  ;;  %v460_v26 = vld [vmem:[#allocation4] sm:$0xff]  ;;  %v494_v31 = vld [vmem:[#allocation4 + $0x18] sm:$0xff]  ;;  %vm435_vm2 = vweird.f32 %v428_v22  ;;  %v441_v40 = vand.u32 2147483648, %v428_v22  ;;  %v439_v43 = vand.u32 2147483647, %v428_v22 }
 0x24e   : > { %v495_v28 = vsub.f32 %v493_v24, %v458_v23  ;;  %v462_v29 = vsub.f32 %v460_v26, %v458_v23  ;;  %v461_v33 = vld [vmem:[#allocation4 + $0x8] sm:$0xff]  ;;  %v496_v35 = vsub.f32 %v494_v31, %v459_v30  ;;  %v470_v5 = vld [vmem:[#allocation11] sm:$0xff]  ;;  %v471_v6 = vld [vmem:[#allocation11 + $0x8] sm:$0xff] }
 0x24f   : > { %v463_v37 = vsub.f32 %v461_v33, %v459_v30  ;;  %v442_v48 = vor.u32 1.1754944e-38, %v441_v40  ;;  %vm440_vm7 = vcmp.eq.f32.partialorder %v439_v43, 8.507059e+37  ;;  %v503_v3 = vld [vmem:[#allocation11 + $0x10] sm:$0xff]  ;;  %v504_v4 = vld [vmem:[#allocation11 + $0x18] sm:$0xff]  ;;  %v472_v15 = vld [vmem:[#allocation11 + $0x20] sm:$0xff] }
 0x250   : > { %v497_v32 = vmul.f32 1.442695, %v495_v28  ;;  %v464_v34 = vmul.f32 1.442695, %v462_v29  ;;  %v499_v44 = vmul.f32 1.442695, %v496_v35 }
 0x251   : > { %v466_v46 = vmul.f32 1.442695, %v463_v37  ;;  %v505_v13 = vld [vmem:[#allocation11 + $0x30] sm:$0xff]  ;;  %v506_v14 = vld [vmem:[#allocation11 + $0x38] sm:$0xff]  ;;  %v473_v16 = vld [vmem:[#allocation11 + $0x28] sm:$0xff] }
 0x252   : > { %v429_v27 = vld [vmem:[#allocation3 + $0x8] sm:$0xff] }
 0x253   : > { %801 = vrcp.f32 %v429_v27  ;;  %v800_v36 = vpop.eup %799  ;;  %vm449_vm4 = vweird.f32 %v429_v27  ;;  %v455_v50 = vand.u32 2147483648, %v429_v27  ;;  %v453_v53 = vand.u32 2147483647, %v429_v27 }
 0x254   : > { %v431_v39 = vmul.f32 %v800_v36, %v428_v22  ;;  %803 = vpow2.f32 %v497_v32  ;;  %vm436_vm3 = vweird.f32 %v800_v36 }
 0x255   : > { %805 = vpow2.f32 %v464_v34  ;;  %vm437_vm6 = vmor %vm435_vm2, %vm436_vm3  ;;  %v456_v58 = vor.u32 1.1754944e-38, %v455_v50  ;;  %vm454_vm9 = vcmp.eq.f32.partialorder %v453_v53, 8.507059e+37 }
 0x256   : > { %v432_v42 = vsub.f32 1.0, %v431_v39  ;;  %807 = vpow2.f32 %v499_v44 }
 0x257   : > { %809 = vpow2.f32 %v466_v46 }
 0x258   : > { %v433_v47 = vmul.f32 %v800_v36, %v432_v42 }
 0x259   : > { %v802_v38 = vpop.eup %801 }
 0x25a   : > { %v445_v41 = vmul.f32 %v802_v38, %v429_v27  ;;  %vm450_vm5 = vweird.f32 %v802_v38  ;;  %v804_v51 = vpop.eup %803  ;;  %v434_v52 = vadd.f32 %v800_v36, %v433_v47 }
 0x25b   : > { %v806_v54 = vpop.eup %805  ;;  %vm451_vm8 = vmor %vm449_vm4, %vm450_vm5 }
 0x25c   : > { %v446_v45 = vsub.f32 1.0, %v445_v41  ;;  %v438_v56 = vsel %vm437_vm6, %v800_v36, %v434_v52  ;;  %v808_v62 = vpop.eup %807 }
 0x25d   : > { %v443_v57 = vsel %vm440_vm7, %v442_v48, %v438_v56  ;;  %v810_v63 = vpop.eup %809 }
 0x25e   : > { %v447_v49 = vmul.f32 %v802_v38, %v446_v45  ;;  %v501_v59 = vmul.f32 %v804_v51, %v443_v57  ;;  %v468_v60 = vmul.f32 %v806_v54, %v443_v57 }
 0x260   : > { %v448_v55 = vadd.f32 %v802_v38, %v447_v49  ;;  %509 = vperm.xlu1 %798, %v501_v59   ;;  %476 = vperm.xlu0 %797, %v468_v60  }
 0x262   : > { %v452_v61 = vsel %vm451_vm8, %v802_v38, %v448_v55 }
 0x263   : > { %v457_v0 = vsel %vm454_vm9, %v456_v58, %v452_v61 }
 0x264   : > { %v502_v1 = vmul.f32 %v808_v62, %v457_v0  ;;  %v469_v2 = vmul.f32 %v810_v63, %v457_v0 }
 0x268   : > { %514 = vperm.xlu1 %798, %v502_v1   ;;  %481 = vperm.xlu0 %797, %v469_v2  }
 0x2d2   : > { %v510_v7 = vpop.permute.xlu1 %509  ;;  %v477_v8 = vpop.permute.xlu0 %476 }
 0x2d3   : > { %v517_v9 = vmul.f32 %v510_v7, %v503_v3  ;;  %v518_v10 = vmul.f32 %v510_v7, %v504_v4  ;;  %v484_v11 = vmul.f32 %v477_v8, %v470_v5  ;;  %v485_v12 = vmul.f32 %v477_v8, %v471_v6 }
 0x2d5   : > { %521 = vst [vmem:[#allocation11 + $0x10] sm:$0xff] %v517_v9 }
 0x2d6   : > { %522 = vst [vmem:[#allocation11 + $0x18] sm:$0xff] %v518_v10 }
 0x2d7   : > { %488 = vst [vmem:[#allocation11] sm:$0xff] %v484_v11 }
 0x2d8   : > { %489 = vst [vmem:[#allocation11 + $0x8] sm:$0xff] %v485_v12 }
 0x2da   : > { %v515_v17 = vpop.permute.xlu1 %514  ;;  %v482_v18 = vpop.permute.xlu0 %481 }
 0x2db   : > { %v519_v19 = vmul.f32 %v515_v17, %v505_v13  ;;  %v520_v20 = vmul.f32 %v515_v17, %v506_v14  ;;  %v486_v21 = vmul.f32 %v482_v18, %v472_v15  ;;  %v487_v22 = vmul.f32 %v482_v18, %v473_v16 }
 0x2dd   : > { %523 = vst [vmem:[#allocation11 + $0x30] sm:$0xff] %v519_v19 }
 0x2de   : > { %524 = vst [vmem:[#allocation11 + $0x38] sm:$0xff] %v520_v20 }
 0x2df   : > { %490 = vst [vmem:[#allocation11 + $0x20] sm:$0xff] %v486_v21 }
 0x2e0   : > { %491 = vst [vmem:[#allocation11 + $0x28] sm:$0xff] %v487_v22 }
 0x2e1 PF: > { %p720_p3 = scmp.eq.s32.totalorder %s1089_s11, 1  ;;  %s536_s5 = sshll.u32 %s1206_s3, 4  ;;  %s537_s5 = int_to_ptr.hbm [resolvable:$true] %s536_s5 }
 0x2e2   : > { %s999_s8 = smov [#allocation11]   ;;  %s1000_s10 = smov 512  }
 0x2e3   : > { %s534_s9 = sshll.u32 %s999_s8, 4  ;;  %s1001_s20 = smov 32   ;;  %s535_s9 = int_to_ptr.vmem [resolvable:$true] %s534_s9 }
 0x2e4   : > { %703 = dma.vmem_to_hbm [thread:$0]  (%p720_p3), %s535_s9, 1024, %s537_s5, [#allocation7], %s1000_s10, %s1000_s10, %s1001_s20  }
 0x2e5   : > { %962 = dma.done.wait (%p720_p3), [#allocation7], 1024  }
 0x2e6   : > { %964 = vsyncadd (%p720_p3), [#allocation7], 4294966272 }
 0x2e7 PF: > { %s18_s17 = sadd.s32 1, %s987_s17   ;;  %s1211_s12 = smov %s971_s13 }
 0x2e8   : > { %p15_p4 = scmp.ge.s32.totalorder %s18_s17, 4   ;;  %s1212_s13 = smov %s975_s14 }
 0x2e9   : > { %s1213_s14 = smov %s1070_s25  ;;  %s1214_s15 = smov %s983_s16 }
 0x2ea   : > { %s1215_s16 = smov %s1217_s18  ;;  %17 = sbr.rel (!%p15_p4) target bundleno = 6 (0x6), region = 98 }
 0x2ef   :  { %553 = vsyncpa [#allocation6], 1 }
 0x2f0   :  { %555 = vsyncpa [#allocation6 + $0x1], 1 }
 0x2f1   :  { %556 = vsyncpa [#allocation9], 1 }
 0x2f2   :  { %558 = vsyncpa [#allocation9 + $0x1], 1 }
 0x2f3   :  { %559 = vsyncpa [#allocation7], 1 }
 0x2f4   :  { %561 = vsyncpa [#allocation7 + $0x1], 1 }

</bundles_post_ra>
